<compile_context>
chip_gen: v7x
topology: tpu7x:2x2x1
jax: 0.10.0
libtpu: 0.0.40
codegen_flags: <defaults>
</compile_context>

<pallas_src>
import functools

import jax
import jax.numpy as jnp
from jax.experimental import pallas as pl
from jax.experimental.pallas import tpu as pltpu

PAD_IDX = 0


# ----------------------------------------------------------------------------
# Generation-aware tiling
# ----------------------------------------------------------------------------
def _device_budget():
    """(per-buffer streamed-tile budget, scoped VMEM limit) by TPU generation.

    v5e / v6e: 128 MiB physical VMEM and lower HBM BW -> bigger chunks.
    v7x / unknown: only 64 MiB VMEM -> conservative.  Budgets leave headroom
    for double-buffered inputs plus full-tile f32 temporaries (exp / select).
    """
    try:
        kind = jax.devices()[0].device_kind.lower()
    except Exception:  # pragma: no cover - defensive
        kind = ""
    if ("v5" in kind) or ("v6" in kind):
        return 6 * 1024 * 1024, 64 * 1024 * 1024
    return 3 * 1024 * 1024, 40 * 1024 * 1024


def _choose_tiles(B, T, V, itemsize, max_tile_bytes):
    """Pick (batch rows per step BB, vocab chunk vt).

    vt is the largest 128-aligned divisor of V whose single-row slab fits the
    budget (so no out-of-bounds lane masking is ever needed); BB is then the
    largest divisor of B keeping the (BB, T, vt) tile inside the budget.
    """
    row_bytes = T * itemsize
    if V % 128 == 0:
        vt = 128
        d = V // 128
        for f in range(d, 0, -1):
            if d % f == 0 and row_bytes * 128 * f <= max_tile_bytes:
                vt = 128 * f
                break
    else:
        # TODO(synk): non-128-aligned vocab is streamed as one full chunk.
        vt = V
    bb = 1
    for f in range(B, 0, -1):
        if B % f == 0 and f * row_bytes * vt <= max_tile_bytes:
            bb = f
            break
    return bb, vt


# ----------------------------------------------------------------------------
# Kernel 1: language-model loss == nn.CrossEntropyLoss(ignore_index=pad_idx)
# Grid (B//BB, K): online LSE over V chunks; per-row partial loss / count out.
# ----------------------------------------------------------------------------
def _lm_loss_kernel(logits_ref, labels_ref, loss_ref, cnt_ref,
                    m_s, s_s, p_s, *, pad_idx, v_tile):
    k = pl.program_id(1)
    k_last = pl.num_programs(1) - 1

    @pl.when(k == 0)
    def _init():
        m_s[...] = jnp.full(m_s.shape, -jnp.inf, jnp.float32)
        s_s[...] = jnp.zeros(s_s.shape, jnp.float32)
        p_s[...] = jnp.zeros(p_s.shape, jnp.float32)

    # Streamed tile may be bf16; math is f32 (vreg-level convert, fused).
    zf = logits_ref[...].astype(jnp.float32)                # (BB, T, vt)
    labels = labels_ref[...]                                # (BB, T, 1) i32

    # Online logsumexp over vocab chunks (f32 accumulation).
    tile_max = jnp.max(zf, axis=-1, keepdims=True)          # (BB, T, 1)
    m_old = m_s[...]
    m_new = jnp.maximum(m_old, tile_max)
    alpha = jnp.exp(m_old - m_new)
    s_s[...] = s_s[...] * alpha + jnp.sum(jnp.exp(zf - m_new), axis=-1, keepdims=True)
    m_s[...] = m_new

    # Gather the logit at the target index without a materialized one-hot:
    # local 0..vt-1 lane iota vs. chunk-shifted label (a (BB,T,1)-sized shift,
    # not a full-tile iota add).  Labels outside this chunk never match.
    lane = jax.lax.broadcasted_iota(jnp.int32, zf.shape, 2)
    lbl_local = labels - k * v_tile
    p_s[...] += jnp.sum(jnp.where(lane == lbl_local, zf, 0.0),
                        axis=-1, keepdims=True)

    @pl.when(k == k_last)
    def _finalize():
        lse = m_s[...] + jnp.log(s_s[...])                  # (BB, T, 1)
        valid = (labels != pad_idx).astype(jnp.float32)     # (BB, T, 1)
        loss_ref[...] = jnp.sum(valid * (lse - p_s[...]), axis=1, keepdims=True)
        cnt_ref[...] = jnp.sum(valid, axis=1, keepdims=True)


def language_model_loss(model_output, target, pad_idx=PAD_IDX, *,
                        stream_dtype=None, max_tile_bytes=None):
    """CrossEntropyLoss(ignore_index=pad_idx) over (B, T, V) logits vs (B, T) labels."""
    B, T, V = model_output.shape
    if stream_dtype is not None:
        model_output = model_output.astype(stream_dtype)    # halve HBM bytes (bf16)
    tile_budget, vmem_limit = _device_budget()
    if max_tile_bytes is not None:
        tile_budget = max_tile_bytes
    bb, vt = _choose_tiles(B, T, V, model_output.dtype.itemsize, tile_budget)
    K = pl.cdiv(V, vt)
    labels = target.astype(jnp.int32).reshape(B, T, 1)
    n = B * T * V

    loss_p, cnt_p = pl.pallas_call(
        functools.partial(_lm_loss_kernel, pad_idx=pad_idx, v_tile=vt),
        out_shape=(jax.ShapeDtypeStruct((B, 1, 1), jnp.float32),
                   jax.ShapeDtypeStruct((B, 1, 1), jnp.float32)),
        grid_spec=pltpu.PrefetchScalarGridSpec(
            num_scalar_prefetch=0,
            grid=(B // bb, K),
            in_specs=[
                pl.BlockSpec((bb, T, vt), lambda b, k: (b, 0, k)),
                pl.BlockSpec((bb, T, 1), lambda b, k: (b, 0, 0)),
            ],
            out_specs=(
                pl.BlockSpec((bb, 1, 1), lambda b, k: (b, 0, 0)),
                pl.BlockSpec((bb, 1, 1), lambda b, k: (b, 0, 0)),
            ),
            scratch_shapes=[pltpu.VMEM((bb, T, 1), jnp.float32)] * 3,
        ),
        compiler_params=pltpu.CompilerParams(
            # TODO(synk): on v7x (2 TCs/chip) switch the batch axis to
            # pltpu.CORE_PARALLEL once the batch-block grid extent is >= 2.
            dimension_semantics=("parallel", "arbitrary"),
            vmem_limit_bytes=vmem_limit),
        cost_estimate=pl.CostEstimate(
            flops=int(6 * n),
            transcendentals=int(n),
            bytes_accessed=int(n * model_output.dtype.itemsize + B * T * 4 + 2 * B * 4)),
    )(model_output, labels)

    # Final tiny reduction in JAX (keeps batch axis parallelizable in the kernel).
    return jnp.sum(loss_p) / jnp.sum(cnt_p)


# ----------------------------------------------------------------------------
# Kernel 2: StructureCriterion tensor math, given precomputed scorer scores.
# Grid (B//BB, K): per-row gathered logprobs + online entropy over V chunks;
# per-row partial loss numerator out; normalization in the wrapper.
# ----------------------------------------------------------------------------
def _structure_loss_kernel(logp_ref, seq_ref, mask_ref, scores_ref, loss_num_ref,
                           g_s, m_s, s1_s, s2_s,
                           *, entropy_reward_weight, v_tile, nonpositive_logprobs):
    k = pl.program_id(1)
    k_last = pl.num_programs(1) - 1
    ent_on = entropy_reward_weight > 0.0

    @pl.when(k == 0)
    def _init():
        g_s[...] = jnp.zeros(g_s.shape, jnp.float32)
        m_s[...] = jnp.full(m_s.shape, -jnp.inf, jnp.float32)
        s1_s[...] = jnp.zeros(s1_s.shape, jnp.float32)
        s2_s[...] = jnp.zeros(s2_s.shape, jnp.float32)

    zf = logp_ref[...].astype(jnp.float32)                  # (BB, T, vt)
    seq = seq_ref[...]                                      # (BB, T, 1) i32

    # Gather logprob at the sampled token (local iota vs chunk-shifted index).
    lane = jax.lax.broadcasted_iota(jnp.int32, zf.shape, 2)
    seq_local = seq - k * v_tile
    g_s[...] += jnp.sum(jnp.where(lane == seq_local, zf, 0.0),
                        axis=-1, keepdims=True)

    if ent_on:
        if nonpositive_logprobs:
            # z <= 0  ->  exp(z) in (0, 1]; no max-tracking / rescale needed.
            e = jnp.exp(zf)
            s1_s[...] += jnp.sum(e, axis=-1, keepdims=True)
            s2_s[...] += jnp.sum(e * zf, axis=-1, keepdims=True)
        else:
            # General online entropy: H = lse - (sum e*z)/(sum e), e = exp(z-m).
            tile_max = jnp.max(zf, axis=-1, keepdims=True)
            m_old = m_s[...]
            m_new = jnp.maximum(m_old, tile_max)
            alpha = jnp.exp(m_old - m_new)
            e = jnp.exp(zf - m_new)
            s1_s[...] = s1_s[...] * alpha + jnp.sum(e, axis=-1, keepdims=True)
            s2_s[...] = s2_s[...] * alpha + jnp.sum(e * zf, axis=-1, keepdims=True)
            m_s[...] = m_new

    @pl.when(k == k_last)
    def _finalize():
        mask = mask_ref[...]                                # (BB, T, 1) f32
        msum = jnp.sum(mask, axis=1, keepdims=True)         # (BB, 1, 1)
        score = scores_ref[...]                             # (BB, 1, 1)
        if ent_on:
            if nonpositive_logprobs:
                lse = jnp.log(s1_s[...])
            else:
                lse = m_s[...] + jnp.log(s1_s[...])
            entropy = lse - s2_s[...] * pl.reciprocal(s1_s[...], approx=False)
            ent_mean = (jnp.sum(entropy * mask, axis=1, keepdims=True)
                        * pl.reciprocal(msum, approx=False))
            score = score + entropy_reward_weight * ent_mean
        # baseline = (scores.sum(1, keepdim) - scores) / scores.shape[1] == 0
        # because scores has a single column, so `scores` is unchanged.
        # TODO(synk): self_cider_reward_weight branch needs host-side eigvalsh of
        # CIDEr self-similarity matrices; not representable in a TPU kernel.
        loss_num_ref[...] = jnp.sum(-g_s[...] * mask, axis=1, keepdims=True) * score


def structure_loss(sample_logprobs, sample_sequence, scores, entropy_reward_weight,
                   *, assume_nonpositive_logprobs=True, stream_dtype=None,
                   max_tile_bytes=None):
    B, T, V = sample_logprobs.shape
    if stream_dtype is not None:
        sample_logprobs = sample_logprobs.astype(stream_dtype)
    tile_budget, vmem_limit = _device_budget()
    if max_tile_bytes is not None:
        tile_budget = max_tile_bytes
    bb, vt = _choose_tiles(B, T, V, sample_logprobs.dtype.itemsize, tile_budget)
    K = pl.cdiv(V, vt)
    seq = sample_sequence.astype(jnp.int32)

    # mask = cat([ones(B,1), (seq > 0)[:, :-1]], 1)  -- O(B*T) shift, done in JAX.
    mask = jnp.concatenate(
        [jnp.ones((B, 1), jnp.float32), (seq[:, :-1] > 0).astype(jnp.float32)], axis=1)

    n = B * T * V
    ent_on = float(entropy_reward_weight) > 0.0

    loss_num = pl.pallas_call(
        functools.partial(_structure_loss_kernel,
                          entropy_reward_weight=float(entropy_reward_weight),
                          v_tile=vt,
                          nonpositive_logprobs=bool(assume_nonpositive_logprobs)),
        out_shape=jax.ShapeDtypeStruct((B, 1, 1), jnp.float32),
        grid_spec=pltpu.PrefetchScalarGridSpec(
            num_scalar_prefetch=0,
            grid=(B // bb, K),
            in_specs=[
                pl.BlockSpec((bb, T, vt), lambda b, k: (b, 0, k)),
                pl.BlockSpec((bb, T, 1), lambda b, k: (b, 0, 0)),
                pl.BlockSpec((bb, T, 1), lambda b, k: (b, 0, 0)),
                pl.BlockSpec((bb, 1, 1), lambda b, k: (b, 0, 0)),
            ],
            out_specs=pl.BlockSpec((bb, 1, 1), lambda b, k: (b, 0, 0)),
            scratch_shapes=[pltpu.VMEM((bb, T, 1), jnp.float32)] * 4,
        ),
        compiler_params=pltpu.CompilerParams(
            # TODO(synk): on v7x switch the batch axis to pltpu.CORE_PARALLEL.
            dimension_semantics=("parallel", "arbitrary"),
            vmem_limit_bytes=vmem_limit),
        cost_estimate=pl.CostEstimate(
            flops=int((8 if ent_on else 3) * n),
            transcendentals=int((1 if ent_on else 0) * n),
            bytes_accessed=int(n * sample_logprobs.dtype.itemsize + 3 * B * T * 4 + B * 4)),
    )(sample_logprobs, seq.reshape(B, T, 1), mask.reshape(B, T, 1),
      scores.reshape(B, 1, 1))

    loss = jnp.sum(loss_num) / jnp.sum(mask)
    # out['reward'] = raw scorer scores (identity passthrough, no kernel needed).
    return loss, scores


def reinforcement_learning_loss(model_output, sample_sequence, sample_logprobs,
                                target, scorer_scores, *,
                                structure_loss_weight, entropy_reward_weight,
                                pad_idx=PAD_IDX,
                                assume_nonpositive_logprobs=True,
                                stream_dtype=None, max_tile_bytes=None):
    """Mirrors ReinforcementLearningLoss.forward.

    structure_loss_weight / entropy_reward_weight select trace-time branches,
    so they must be static Python floats (not traced values).
    """
    target_t = target[:, 1:].astype(jnp.int32)              # drop BOS column
    if structure_loss_weight < 1:
        lm_loss = language_model_loss(model_output, target_t, pad_idx,
                                      stream_dtype=stream_dtype,
                                      max_tile_bytes=max_tile_bytes)
    else:
        lm_loss = jnp.float32(0.0)
    if structure_loss_weight > 0:
        st_loss, reward = structure_loss(
            sample_logprobs, sample_sequence, scorer_scores, entropy_reward_weight,
            assume_nonpositive_logprobs=assume_nonpositive_logprobs,
            stream_dtype=stream_dtype, max_tile_bytes=max_tile_bytes)
    else:
        st_loss, reward = jnp.float32(0.0), jnp.zeros_like(scorer_scores)
    total = (1.0 - structure_loss_weight) * lm_loss + structure_loss_weight * st_loss
    return {"loss": total,
            "language_model_loss": lm_loss,
            "structure_loss": st_loss,
            "reward": reward}


# ----------------------------------------------------------------------------
# Pure-JAX reference (replicates the PyTorch math) for a sanity check.
# ----------------------------------------------------------------------------
def _reference(model_output, sample_sequence, sample_logprobs, target, scores,
               w, ent_w, pad_idx):
    tgt = target[:, 1:].astype(jnp.int32)
    B, T, V = model_output.shape
    logits = model_output.reshape(-1, V)
    labels = tgt.reshape(-1)
    lse = jax.scipy.special.logsumexp(logits, axis=-1)
    picked = jnp.take_along_axis(logits, labels[:, None], axis=1)[:, 0]
    valid = (labels != pad_idx).astype(jnp.float32)
    lm = jnp.sum(valid * (lse - picked)) / jnp.sum(valid)

    mask_raw = (sample_sequence > 0).astype(jnp.float32)
    mask = jnp.concatenate([jnp.ones((B, 1), jnp.float32), mask_raw[:, :-1]], 1)
    p = jax.nn.softmax(sample_logprobs, axis=2)
    lp = jax.nn.log_softmax(sample_logprobs, axis=2)
    ent = -(p * lp).sum(2)
    ent_mean = (ent * mask).sum(1, keepdims=True) / mask.sum(1, keepdims=True)
    sc = scores + ent_w * ent_mean
    g = jnp.take_along_axis(sample_logprobs, sample_sequence[..., None], axis=2)[..., 0]
    st = jnp.sum(-g * mask * sc) / jnp.sum(mask)
    return (1.0 - w) * lm + w * st, lm, st


# ----------------------------------------------------------------------------
# Self-test
# ----------------------------------------------------------------------------
def _run_case(B, T, V, key, *, structure_loss_weight, entropy_reward_weight,
              stream_dtype=None, max_tile_bytes=None,
              assume_nonpositive_logprobs=True, rtol=1e-5, atol=1e-5):
    k1, k2, k3, k4, k5 = jax.random.split(key, 5)
    model_output = jax.random.normal(k1, (B, T, V), jnp.float32)
    sample_logprobs = jax.nn.log_softmax(
        jax.random.normal(k2, (B, T, V), jnp.float32), axis=-1)
    sample_sequence = jax.random.randint(k3, (B, T), 1, V).astype(jnp.int32)
    tail = jnp.arange(T)[None, :] >= (T - 2 - jnp.arange(B)[:, None] % 3)
    sample_sequence = jnp.where(tail, 0, sample_sequence)
    target = jax.random.randint(k4, (B, T + 1), 1, V).astype(jnp.int32)
    ttail = jnp.arange(T + 1)[None, :] >= (T - jnp.arange(B)[:, None] % 4)
    target = jnp.where(ttail, 0, target)
    # Synthetic stand-in for host-side CIDEr/BLEU scorer output (shape (B, 1)).
    scorer_scores = jax.random.uniform(k5, (B, 1), jnp.float32)

    out = reinforcement_learning_loss(
        model_output, sample_sequence, sample_logprobs, target, scorer_scores,
        structure_loss_weight=structure_loss_weight,
        entropy_reward_weight=entropy_reward_weight,
        assume_nonpositive_logprobs=assume_nonpositive_logprobs,
        stream_dtype=stream_dtype, max_tile_bytes=max_tile_bytes)
    jax.block_until_ready(out["loss"])

    ref_total, ref_lm, ref_st = _reference(
        model_output, sample_sequence, sample_logprobs, target, scorer_scores,
        structure_loss_weight, entropy_reward_weight, PAD_IDX)

    assert jnp.allclose(out["language_model_loss"], ref_lm, rtol=rtol, atol=atol), (
        out["language_model_loss"], ref_lm)
    assert jnp.allclose(out["structure_loss"], ref_st, rtol=rtol, atol=atol), (
        out["structure_loss"], ref_st)
    assert jnp.allclose(out["loss"], ref_total, rtol=rtol, atol=atol), (
        out["loss"], ref_total)
    assert jnp.allclose(out["reward"], scorer_scores)


if __name__ == "__main__":
    root = jax.random.PRNGKey(0)
    k_a, k_b, k_c = jax.random.split(root, 3)

    # 1) Default device-sized tiling: single vocab chunk, batch rows blocked.
    _run_case(2, 8, 128, k_a,
              structure_loss_weight=0.5, entropy_reward_weight=0.1)

    # 2) Forced tiny tile budget: multi-chunk online LSE (K=3) + batch blocking
    #    (BB=2), exercising the general (max-tracked) entropy path.
    _run_case(4, 8, 384, k_b,
              structure_loss_weight=0.5, entropy_reward_weight=0.1,
              max_tile_bytes=8192, assume_nonpositive_logprobs=False)

    # 3) bf16 streaming (halves HBM traffic); f32 accumulation on-chip.
    _run_case(2, 16, 2048, k_c,
              structure_loss_weight=0.5, entropy_reward_weight=0.1,
              stream_dtype=jnp.bfloat16, rtol=2e-2, atol=2e-2)

    print("KERNEL_OK")
</pallas_src>

<mosaic_0001>
module attributes {stable_mosaic.version = 11 : i64} {
  func.func @_lm_loss_kernel(%arg0: i32, %arg1: i32, %arg2: memref<2x8x128xf32, #tpu.memory_space<vmem>>, %arg3: memref<2x8x1xi32, #tpu.memory_space<vmem>>, %arg4: memref<2x1x1xf32, #tpu.memory_space<vmem>>, %arg5: memref<2x1x1xf32, #tpu.memory_space<vmem>>, %arg6: memref<2x8x1xf32, #tpu.memory_space<vmem>>, %arg7: memref<2x8x1xf32, #tpu.memory_space<vmem>>, %arg8: memref<2x8x1xf32, #tpu.memory_space<vmem>>) attributes {dimension_semantics = [#tpu.dimension_semantics<parallel>, #tpu.dimension_semantics<arbitrary>], iteration_bounds = array<i64: 1, 1>, scalar_prefetch = 0 : i64, scratch_operands = 3 : i64, tpu.core_type = #tpu.core_type<tc>, window_params = [{transform_indices = @transform_0, window_bounds = array<i64: 2, 8, 128>}, {transform_indices = @transform_1, window_bounds = array<i64: 2, 8, 1>}, {transform_indices = @transform_2, window_bounds = array<i64: 2, 1, 1>}, {transform_indices = @transform_3, window_bounds = array<i64: 2, 1, 1>}]} {
    %c0_i32 = arith.constant 0 : i32
    %0 = arith.cmpi eq, %arg1, %c0_i32 : i32
    %1 = arith.extui %0 : i1 to i32
    %c0_i32_0 = arith.constant 0 : i32
    %2 = arith.cmpi ne, %1, %c0_i32_0 : i32
    scf.if %2 {
      %cst_29 = arith.constant 0xFF800000 : f32
      %37 = vector.broadcast %cst_29 : f32 to vector<2x8x1xf32>
      %c0_30 = arith.constant 0 : index
      %c0_31 = arith.constant 0 : index
      %c0_32 = arith.constant 0 : index
      %38 = vector.load %arg6[%c0_30, %c0_31, %c0_32] : memref<2x8x1xf32, #tpu.memory_space<vmem>>, vector<2x8x1xf32>
      tpu.vector_store %arg6[%c0_30, %c0_31, %c0_32], %37 {strides = array<i32>} : memref<2x8x1xf32, #tpu.memory_space<vmem>>, vector<2x8x1xf32>,
      %cst_33 = arith.constant 0.000000e+00 : f32
      %39 = vector.broadcast %cst_33 : f32 to vector<2x8x1xf32>
      %c0_34 = arith.constant 0 : index
      %c0_35 = arith.constant 0 : index
      %c0_36 = arith.constant 0 : index
      %40 = vector.load %arg7[%c0_34, %c0_35, %c0_36] : memref<2x8x1xf32, #tpu.memory_space<vmem>>, vector<2x8x1xf32>
      tpu.vector_store %arg7[%c0_34, %c0_35, %c0_36], %39 {strides = array<i32>} : memref<2x8x1xf32, #tpu.memory_space<vmem>>, vector<2x8x1xf32>,
      %cst_37 = arith.constant 0.000000e+00 : f32
      %41 = vector.broadcast %cst_37 : f32 to vector<2x8x1xf32>
      %c0_38 = arith.constant 0 : index
      %c0_39 = arith.constant 0 : index
      %c0_40 = arith.constant 0 : index
      %42 = vector.load %arg8[%c0_38, %c0_39, %c0_40] : memref<2x8x1xf32, #tpu.memory_space<vmem>>, vector<2x8x1xf32>
      tpu.vector_store %arg8[%c0_38, %c0_39, %c0_40], %41 {strides = array<i32>} : memref<2x8x1xf32, #tpu.memory_space<vmem>>, vector<2x8x1xf32>,
    } else {
    }
    %c0 = arith.constant 0 : index
    %c0_1 = arith.constant 0 : index
    %c0_2 = arith.constant 0 : index
    %3 = vector.load %arg2[%c0, %c0_1, %c0_2] : memref<2x8x128xf32, #tpu.memory_space<vmem>>, vector<2x8x128xf32>
    %c0_3 = arith.constant 0 : index
    %c0_4 = arith.constant 0 : index
    %c0_5 = arith.constant 0 : index
    %4 = vector.load %arg3[%c0_3, %c0_4, %c0_5] : memref<2x8x1xi32, #tpu.memory_space<vmem>>, vector<2x8x1xi32>
    %cst = arith.constant dense<0xFF800000> : vector<2x8xf32>
    %5 = vector.multi_reduction <maximumf>, %3, %cst [2] : vector<2x8x128xf32> to vector<2x8xf32>
    %6 = vector.shape_cast %5 : vector<2x8xf32> to vector<2x8x1xf32>
    %c0_6 = arith.constant 0 : index
    %c0_7 = arith.constant 0 : index
    %c0_8 = arith.constant 0 : index
    %7 = vector.load %arg6[%c0_6, %c0_7, %c0_8] : memref<2x8x1xf32, #tpu.memory_space<vmem>>, vector<2x8x1xf32>
    %8 = arith.maximumf %7, %6 : vector<2x8x1xf32>
    %9 = arith.subf %7, %8 : vector<2x8x1xf32>
    %10 = math.exp %9 : vector<2x8x1xf32>
    %c0_9 = arith.constant 0 : index
    %c0_10 = arith.constant 0 : index
    %c0_11 = arith.constant 0 : index
    %11 = vector.load %arg7[%c0_9, %c0_10, %c0_11] : memref<2x8x1xf32, #tpu.memory_space<vmem>>, vector<2x8x1xf32>
    %12 = arith.mulf %11, %10 : vector<2x8x1xf32>
    %13 = vector.broadcast %8 : vector<2x8x1xf32> to vector<2x8x128xf32>
    %14 = arith.subf %3, %13 : vector<2x8x128xf32>
    %15 = math.exp %14 : vector<2x8x128xf32>
    %cst_12 = arith.constant dense<0.000000e+00> : vector<2x8xf32>
    %16 = vector.multi_reduction <add>, %15, %cst_12 [2] : vector<2x8x128xf32> to vector<2x8xf32>
    %17 = vector.shape_cast %16 : vector<2x8xf32> to vector<2x8x1xf32>
    %18 = arith.addf %12, %17 : vector<2x8x1xf32>
    %c0_13 = arith.constant 0 : index
    %c0_14 = arith.constant 0 : index
    %c0_15 = arith.constant 0 : index
    %19 = vector.load %arg7[%c0_13, %c0_14, %c0_15] : memref<2x8x1xf32, #tpu.memory_space<vmem>>, vector<2x8x1xf32>
    tpu.vector_store %arg7[%c0_13, %c0_14, %c0_15], %18 {strides = array<i32>} : memref<2x8x1xf32, #tpu.memory_space<vmem>>, vector<2x8x1xf32>,
    %c0_16 = arith.constant 0 : index
    %c0_17 = arith.constant 0 : index
    %c0_18 = arith.constant 0 : index
    %20 = vector.load %arg6[%c0_16, %c0_17, %c0_18] : memref<2x8x1xf32, #tpu.memory_space<vmem>>, vector<2x8x1xf32>
    tpu.vector_store %arg6[%c0_16, %c0_17, %c0_18], %8 {strides = array<i32>} : memref<2x8x1xf32, #tpu.memory_space<vmem>>, vector<2x8x1xf32>,
    %21 = tpu.iota {dimensions = array<i32: 2>} : vector<2x8x128xi32>
    %c128_i32 = arith.constant 128 : i32
    %22 = arith.muli %arg1, %c128_i32 : i32
    %23 = vector.broadcast %22 : i32 to vector<2x8x1xi32>
    %24 = arith.subi %4, %23 : vector<2x8x1xi32>
    %c0_19 = arith.constant 0 : index
    %c0_20 = arith.constant 0 : index
    %c0_21 = arith.constant 0 : index
    %25 = vector.load %arg8[%c0_19, %c0_20, %c0_21] : memref<2x8x1xf32, #tpu.memory_space<vmem>>, vector<2x8x1xf32>
    %26 = vector.broadcast %24 : vector<2x8x1xi32> to vector<2x8x128xi32>
    %27 = arith.cmpi eq, %21, %26 : vector<2x8x128xi32>
    %cst_22 = arith.constant 0.000000e+00 : f32
    %28 = vector.broadcast %cst_22 : f32 to vector<2x8x128xf32>
    %29 = arith.select %27, %3, %28 : vector<2x8x128xi1>, vector<2x8x128xf32>
    %cst_23 = arith.constant dense<0.000000e+00> : vector<2x8xf32>
    %30 = vector.multi_reduction <add>, %29, %cst_23 [2] : vector<2x8x128xf32> to vector<2x8xf32>
    %31 = vector.shape_cast %30 : vector<2x8xf32> to vector<2x8x1xf32>
    %32 = arith.addf %25, %31 : vector<2x8x1xf32>
    %c0_24 = arith.constant 0 : index
    %c0_25 = arith.constant 0 : index
    %c0_26 = arith.constant 0 : index
    %33 = vector.load %arg8[%c0_24, %c0_25, %c0_26] : memref<2x8x1xf32, #tpu.memory_space<vmem>>, vector<2x8x1xf32>
    tpu.vector_store %arg8[%c0_24, %c0_25, %c0_26], %32 {strides = array<i32>} : memref<2x8x1xf32, #tpu.memory_space<vmem>>, vector<2x8x1xf32>,
    %c0_i32_27 = arith.constant 0 : i32
    %34 = arith.cmpi eq, %arg1, %c0_i32_27 : i32
    %35 = arith.extui %34 : i1 to i32
    %c0_i32_28 = arith.constant 0 : i32
    %36 = arith.cmpi ne, %35, %c0_i32_28 : i32
    scf.if %36 {
      %c0_29 = arith.constant 0 : index
      %c0_30 = arith.constant 0 : index
      %c0_31 = arith.constant 0 : index
      %37 = vector.load %arg6[%c0_29, %c0_30, %c0_31] : memref<2x8x1xf32, #tpu.memory_space<vmem>>, vector<2x8x1xf32>
      %c0_32 = arith.constant 0 : index
      %c0_33 = arith.constant 0 : index
      %c0_34 = arith.constant 0 : index
      %38 = vector.load %arg7[%c0_32, %c0_33, %c0_34] : memref<2x8x1xf32, #tpu.memory_space<vmem>>, vector<2x8x1xf32>
      %39 = math.log %38 : vector<2x8x1xf32>
      %40 = arith.addf %37, %39 : vector<2x8x1xf32>
      %c0_i32_35 = arith.constant 0 : i32
      %41 = vector.broadcast %c0_i32_35 : i32 to vector<2x8x1xi32>
      %42 = arith.cmpi ne, %4, %41 : vector<2x8x1xi32>
      %43 = arith.extui %42 : vector<2x8x1xi1> to vector<2x8x1xi32>
      %44 = arith.sitofp %43 : vector<2x8x1xi32> to vector<2x8x1xf32>
      %c0_36 = arith.constant 0 : index
      %c0_37 = arith.constant 0 : index
      %c0_38 = arith.constant 0 : index
      %45 = vector.load %arg8[%c0_36, %c0_37, %c0_38] : memref<2x8x1xf32, #tpu.memory_space<vmem>>, vector<2x8x1xf32>
      %46 = arith.subf %40, %45 : vector<2x8x1xf32>
      %47 = arith.mulf %44, %46 : vector<2x8x1xf32>
      %cst_39 = arith.constant dense<0.000000e+00> : vector<2x1xf32>
      %48 = vector.multi_reduction <add>, %47, %cst_39 [1] : vector<2x8x1xf32> to vector<2x1xf32>
      %49 = vector.shape_cast %48 : vector<2x1xf32> to vector<2x1x1xf32>
      %c0_40 = arith.constant 0 : index
      %c0_41 = arith.constant 0 : index
      %c0_42 = arith.constant 0 : index
      %50 = vector.load %arg4[%c0_40, %c0_41, %c0_42] : memref<2x1x1xf32, #tpu.memory_space<vmem>>, vector<2x1x1xf32>
      tpu.vector_store %arg4[%c0_40, %c0_41, %c0_42], %49 {strides = array<i32>} : memref<2x1x1xf32, #tpu.memory_space<vmem>>, vector<2x1x1xf32>,
      %cst_43 = arith.constant dense<0.000000e+00> : vector<2x1xf32>
      %51 = vector.multi_reduction <add>, %44, %cst_43 [1] : vector<2x8x1xf32> to vector<2x1xf32>
      %52 = vector.shape_cast %51 : vector<2x1xf32> to vector<2x1x1xf32>
      %c0_44 = arith.constant 0 : index
      %c0_45 = arith.constant 0 : index
      %c0_46 = arith.constant 0 : index
      %53 = vector.load %arg5[%c0_44, %c0_45, %c0_46] : memref<2x1x1xf32, #tpu.memory_space<vmem>>, vector<2x1x1xf32>
      tpu.vector_store %arg5[%c0_44, %c0_45, %c0_46], %52 {strides = array<i32>} : memref<2x1x1xf32, #tpu.memory_space<vmem>>, vector<2x1x1xf32>,
    } else {
    }
    return
  }
  func.func @transform_0(%arg0: i32, %arg1: i32) -> (i32, i32, i32) {
    %c0_i32 = arith.constant 0 : i32
    %c0_i32_0 = arith.constant 0 : i32
    return %arg0, %c0_i32, %arg1 : i32, i32, i32
  }
  func.func @transform_1(%arg0: i32, %arg1: i32) -> (i32, i32, i32) {
    %c0_i32 = arith.constant 0 : i32
    %c0_i32_0 = arith.constant 0 : i32
    %c0_i32_1 = arith.constant 0 : i32
    return %arg0, %c0_i32, %c0_i32_0 : i32, i32, i32
  }
  func.func @transform_2(%arg0: i32, %arg1: i32) -> (i32, i32, i32) {
    %c0_i32 = arith.constant 0 : i32
    %c0_i32_0 = arith.constant 0 : i32
    %c0_i32_1 = arith.constant 0 : i32
    return %arg0, %c0_i32, %c0_i32_0 : i32, i32, i32
  }
  func.func @transform_3(%arg0: i32, %arg1: i32) -> (i32, i32, i32) {
    %c0_i32 = arith.constant 0 : i32
    %c0_i32_0 = arith.constant 0 : i32
    %c0_i32_1 = arith.constant 0 : i32
    return %arg0, %c0_i32, %c0_i32_0 : i32, i32, i32
  }
}

</mosaic_0001>

<bundles_post_ra>
// kernel: tpu_custom_call.1
= control target key start
LH: loop header
LB: loop body
LE: loop exit
PB: predicated region body
PF: predicated region fallthrough
CT: control target
= control target key end

     0   :  { %vm17_vm0 = vcmask 7168   ;;  %v184_v1 = vmov -inf   ;;  %v185_v3 = vmov 0   ;;  %v186_v4 = vmov 0.0   ;;  %s264_s0 = inlined_call_operand.vmem [shape: f32[2,8,128], index: 0, kind: input, shape index: {}]   ;;  %s265_s1 = inlined_call_operand.vmem [shape: s32[2,8,1], index: 1, kind: input, shape index: {}]   ;;  %s266_s3 = inlined_call_operand.vmem [shape: f32[2,1,1], index: 3, kind: output, shape index: {1}]   ;;  %s267_s2 = inlined_call_operand.vmem [shape: f32[2,1,1], index: 2, kind: output, shape index: {0}]  }
   0x1   :  { %v24_v0 = vld [vmem:[%s264_s0] sm:$0xff]  ;;  %18 = vst.msk [vmem:[#allocation2] sm:$0xff] %vm17_vm0, %v184_v1  ;;  %19 = vst.msk [vmem:[#allocation2 + $0x8] sm:$0xff] %vm17_vm0, %v184_v1  ;;  %v215_v2 = vld [vmem:[%s264_s0 + $0x8] sm:$0xff]  ;;  %170 = vset.pattern.permute.xlu1 %v185_v3  ;;  %171 = vset.pattern.permute.xlu0 %v185_v3  ;;  %vm138_vm3 = vcmask 0   ;;  %v73_v31 = vlaneseq }
   0x2   :  { %28 = vmax.xlane.f32.xlu0 %v24_v0  ;;  %20 = vst.msk [vmem:[#allocation3] sm:$0xff] %vm17_vm0, %v186_v4  ;;  %21 = vst.msk [vmem:[#allocation3 + $0x8] sm:$0xff] %vm17_vm0, %v186_v4  ;;  %v27_v5 = vld [vmem:[%s265_s1 + $0x8] sm:$0xff]  ;;  %v26_v6 = vld [vmem:[%s265_s1] sm:$0xff] }
   0x3   :  { %22 = vst.msk [vmem:[#allocation4] sm:$0xff] %vm17_vm0, %v186_v4  ;;  %23 = vst.msk [vmem:[#allocation4 + $0x8] sm:$0xff] %vm17_vm0, %v186_v4  ;;  %vm113_vm1 = vcmp.ne.s32.totalorder %v27_v5, 0  ;;  %vm112_vm2 = vcmp.ne.s32.totalorder %v26_v6, 0  ;;  %v74_v32 = vand.u32 127, %v73_v31 }
   0x4   :  { %v228_v7 = vsel %vm113_vm1, 1.0, %v186_v4  ;;  %v232_v9 = vsel %vm112_vm2, 1.0, %v186_v4 }
   0x5   :  { %v148_v8 = vsel %vm17_vm0, %v228_v7, 0.0  ;;  %v141_v11 = vsel %vm17_vm0, %v232_v9, 0.0 }
   0x6   :  { %30 = vmax.xlane.f32.xlu0 %v215_v2  ;;  %v149_v10 = vrot.slane %v148_v8, 4  ;;  %v142_v12 = vrot.slane %v141_v11, 4 }
   0x8   :  { %v150_v13 = vadd.f32 %v149_v10, %v148_v8  ;;  %v143_v14 = vadd.f32 %v142_v12, %v141_v11  ;;  %v32_v23 = vld [vmem:[#allocation2] sm:$0xff]  ;;  %v33_v26 = vld [vmem:[#allocation2 + $0x8] sm:$0xff] }
   0x9   :  { %v42_v51 = vld [vmem:[#allocation3] sm:$0xff]  ;;  %v43_v55 = vld [vmem:[#allocation3 + $0x8] sm:$0xff] }
   0xa   :  { %v151_v15 = vrot.slane %v150_v13, 2  ;;  %v144_v16 = vrot.slane %v143_v14, 2  ;;  %v79_v45 = vld [vmem:[#allocation4] sm:$0xff]  ;;  %v80_v60 = vld [vmem:[#allocation4 + $0x8] sm:$0xff] }
   0xc   :  { %v152_v17 = vadd.f32 %v151_v15, %v150_v13  ;;  %v145_v18 = vadd.f32 %v144_v16, %v143_v14 }
   0xe   :  { %v153_v19 = vrot.slane %v152_v17, 1  ;;  %v146_v20 = vrot.slane %v145_v18, 1 }
  0x10   :  { %v154_v21 = vadd.f32 %v153_v19, %v152_v17  ;;  %v147_v22 = vadd.f32 %v146_v20, %v145_v18 }
  0x12   :  { %156 = vst.msk [vmem:[%s266_s3 + $0x1] sm:$0x1] %vm138_vm3, %v154_v21  ;;  %155 = vst.msk [vmem:[%s266_s3] sm:$0x1] %vm138_vm3, %v147_v22 }
  0x1c   :  { %82 = vperm.xlu0 %171, %v26_v6  }
  0x8f   :  { %v29_v24 = vpop.xlane.xlu0 %28 }
  0x90   :  { %v34_v25 = vmax.f32 %v32_v23, %v29_v24 }
  0x92   :  { %v36_v27 = vsub.f32 %v32_v23, %v34_v25  ;;  %71 = vst.msk [vmem:[#allocation2] sm:$0xff] %vm17_vm0, %v34_v25  ;;  %48 = vperm.xlu1 %170, %v34_v25  }
  0x93   :  { %v31_v28 = vpop.xlane.xlu0 %30 }
  0x94   :  { %v35_v29 = vmax.f32 %v33_v26, %v31_v28  ;;  %v38_v48 = vmul.f32 1.442695, %v36_v27 }
  0x96   :  { %v37_v30 = vsub.f32 %v33_v26, %v35_v29  ;;  %72 = vst.msk [vmem:[#allocation2 + $0x8] sm:$0xff] %vm17_vm0, %v35_v29  ;;  %53 = vperm.xlu1 %170, %v35_v29  }
  0x98   :  { %v40_v49 = vmul.f32 1.442695, %v37_v30 }
  0x99   :  { %v102_v3 = vld [vmem:[#allocation2] sm:$0xff] }
  0x9a   :  { %85 = vperm.xlu1 %170, %v27_v5  }
  0x9b   :  { %v83_v33 = vpop.permute.xlu0 %82 }
  0x9c   :  { %vm87_vm4 = vcmp.eq.s32.totalorder %v74_v32, %v83_v33 }
  0x9d   :  { %v89_v34 = vsel %vm87_vm4, %v24_v0, 0.0  ;;  %v103_v11 = vld [vmem:[#allocation2 + $0x8] sm:$0xff] }
  0x9e   :  { %91 = vadd.xlane.f32.xlu0 %v89_v34 }
 0x111   :  { %v49_v35 = vpop.permute.xlu1 %48 }
 0x112   :  { %v56_v36 = vsub.f32 %v24_v0, %v49_v35 }
 0x114   :  { %v58_v37 = vmul.f32 1.442695, %v56_v36 }
 0x115   :  { %v54_v38 = vpop.permute.xlu1 %53 }
 0x116   :  { %172 = vpow2.f32 %v58_v37  ;;  %v57_v39 = vsub.f32 %v215_v2, %v54_v38 }
 0x118   :  { %v60_v40 = vmul.f32 1.442695, %v57_v39 }
 0x119   :  { %v86_v42 = vpop.permute.xlu1 %85 }
 0x11a   :  { %174 = vpow2.f32 %v60_v40  ;;  %vm88_vm5 = vcmp.eq.s32.totalorder %v74_v32, %v86_v42 }
 0x11b   :  { %v90_v44 = vsel %vm88_vm5, %v215_v2, 0.0  ;;  %176 = vpow2.f32 %v38_v48 }
 0x11c   :  { %178 = vpow2.f32 %v40_v49 }
 0x120   :  { %v173_v41 = vpop.eup %172 }
 0x121   :  { %62 = vadd.xlane.f32.xlu1 %v173_v41 }
 0x124   :  { %v175_v43 = vpop.eup %174 }
 0x125   :  { %64 = vadd.xlane.f32.xlu1 %v175_v43  ;;  %v177_v50 = vpop.eup %176 }
 0x126   :  { %v44_v52 = vmul.f32 %v177_v50, %v42_v51  ;;  %v179_v53 = vpop.eup %178 }
 0x127   :  { %v45_v57 = vmul.f32 %v179_v53, %v43_v55 }
 0x129   :  { %93 = vadd.xlane.f32.xlu1 %v90_v44 }
 0x12b   :  { %v92_v46 = vpop.xlane.xlu0 %91 }
 0x12c   :  { %v95_v47 = vadd.f32 %v92_v46, %v79_v45 }
 0x12e   :  { %97 = vst.msk [vmem:[#allocation4] sm:$0xff] %vm17_vm0, %v95_v47 }
 0x135   :  { %v118_v4 = vld [vmem:[#allocation4] sm:$0xff] }
 0x1ae   :  { %v63_v54 = vpop.xlane.xlu1 %62 }
 0x1af   :  { %v66_v56 = vadd.f32 %v63_v54, %v44_v52 }
 0x1b1   :  { %69 = vst.msk [vmem:[#allocation3] sm:$0xff] %vm17_vm0, %v66_v56 }
 0x1b2   :  { %v65_v58 = vpop.xlane.xlu1 %64 }
 0x1b3   :  { %v67_v59 = vadd.f32 %v65_v58, %v45_v57 }
 0x1b5   :  { %70 = vst.msk [vmem:[#allocation3 + $0x8] sm:$0xff] %vm17_vm0, %v67_v59 }
 0x1b6   :  { %v94_v61 = vpop.xlane.xlu1 %93 }
 0x1b7   :  { %v96_v62 = vadd.f32 %v94_v61, %v80_v60 }
 0x1b8   :  { %v104_v63 = vld [vmem:[#allocation3] sm:$0xff] }
 0x1b9   :  { %180 = vlog2.f32 %v104_v63  ;;  %98 = vst.msk [vmem:[#allocation4 + $0x8] sm:$0xff] %vm17_vm0, %v96_v62 }
 0x1bc   :  { %v105_v0 = vld [vmem:[#allocation3 + $0x8] sm:$0xff] }
 0x1bd   :  { %182 = vlog2.f32 %v105_v0 }
 0x1c0   :  { %v119_v14 = vld [vmem:[#allocation4 + $0x8] sm:$0xff] }
 0x1c3   :  { %v181_v1 = vpop.eup %180 }
 0x1c4   :  { %v107_v2 = vmul.f32 0.6931472, %v181_v1 }
 0x1c6   :  { %v110_v5 = vadd.f32 %v107_v2, %v102_v3 }
 0x1c7   :  { %v183_v6 = vpop.eup %182 }
 0x1c8   :  { %v109_v8 = vmul.f32 0.6931472, %v183_v6  ;;  %v120_v10 = vsub.f32 %v110_v5, %v118_v4 }
 0x1ca   :  { %v111_v12 = vadd.f32 %v109_v8, %v103_v11  ;;  %v122_v13 = vmul.f32 %v232_v9, %v120_v10 }
 0x1cc   :  { %v121_v15 = vsub.f32 %v111_v12, %v119_v14  ;;  %v124_v16 = vsel %vm17_vm0, %v122_v13, 0.0 }
 0x1cd   :  { %v125_v17 = vrot.slane %v124_v16, 4 }
 0x1ce   :  { %v123_v18 = vmul.f32 %v228_v7, %v121_v15 }
 0x1cf   :  { %v126_v19 = vadd.f32 %v125_v17, %v124_v16 }
 0x1d0   :  { %v131_v20 = vsel %vm17_vm0, %v123_v18, 0.0 }
 0x1d1   :  { %v132_v21 = vrot.slane %v131_v20, 4  ;;  %v127_v22 = vrot.slane %v126_v19, 2 }
 0x1d3   :  { %v133_v23 = vadd.f32 %v132_v21, %v131_v20  ;;  %v128_v24 = vadd.f32 %v127_v22, %v126_v19 }
 0x1d5   :  { %v134_v25 = vrot.slane %v133_v23, 2  ;;  %v129_v26 = vrot.slane %v128_v24, 1 }
 0x1d7   :  { %v135_v27 = vadd.f32 %v134_v25, %v133_v23  ;;  %v130_v28 = vadd.f32 %v129_v26, %v128_v24 }
 0x1d9   :  { %v136_v29 = vrot.slane %v135_v27, 1  ;;  %139 = vst.msk [vmem:[%s267_s2] sm:$0x1] %vm138_vm3, %v130_v28 }
 0x1db   :  { %v137_v9 = vadd.f32 %v136_v29, %v135_v27 }
 0x1dd   :  { %140 = vst.msk [vmem:[%s267_s2 + $0x1] sm:$0x1] %vm138_vm3, %v137_v9 }

</bundles_post_ra>
